<compile_context>
chip_gen: v7x
topology: tpu7x:2x2x1
jax: 0.10.0
libtpu: 0.0.40
codegen_flags: <defaults>
</compile_context>

<pallas_src>
import jax
import jax.numpy as jnp
from jax import lax
from jax.experimental import pallas as pl
from jax.experimental.pallas import tpu as pltpu


def _linear_kernel(x_ref, wt_ref, o_ref):
    # x_ref:  (B_pad, K_pad)  activations
    # wt_ref: (K_pad, N_pad)  weight already transposed in the wrapper
    # Single MXU pass; contraction on the last dim of x / first dim of wt,
    # no in-kernel transpose or extra VMEM copy.
    o_ref[...] = lax.dot_general(
        x_ref[...],
        wt_ref[...],
        dimension_numbers=(((1,), (0,)), ((), ())),
        preferred_element_type=jnp.float32,
    ).astype(o_ref.dtype)


def _round_up(v, m):
    return (v + m - 1) // m * m


def custom_linear(x, weight):
    """Pallas implementation of CustomLinearModule.forward: F.linear(x, weight)."""
    batch, in_features = x.shape
    out_features, in_features_w = weight.shape
    assert in_features == in_features_w, "weight inner dim must match x last dim"

    # Pad to lane-dense shapes: last dims -> multiple of 128, sublane dim -> multiple of 8.
    b_pad = _round_up(batch, 8)
    k_pad = _round_up(in_features, 128)
    n_pad = _round_up(out_features, 128)

    # Zero-fill padding so the extra K columns contribute 0 to the accumulation.
    x_p = jnp.zeros((b_pad, k_pad), x.dtype).at[:batch, :in_features].set(x)
    # Pre-transpose once in the wrapper (free layout plumbing in XLA): (K_pad, N_pad).
    wt_p = (
        jnp.zeros((k_pad, n_pad), weight.dtype)
        .at[:in_features, :out_features]
        .set(weight.T)
    )

    out_p = pl.pallas_call(
        _linear_kernel,
        out_shape=jax.ShapeDtypeStruct((b_pad, n_pad), x.dtype),
        # Single full-array blocks resident in VMEM; no pipelining needed for ~150 KiB.
        in_specs=[
            pl.BlockSpec(memory_space=pltpu.MemorySpace.VMEM),
            pl.BlockSpec(memory_space=pltpu.MemorySpace.VMEM),
        ],
        out_specs=pl.BlockSpec(memory_space=pltpu.MemorySpace.VMEM),
    )(x_p, wt_p)

    # Slice back to the logical (batch, out_features) result.
    return out_p[:batch, :out_features]


# jit so the pad / transpose / slice plumbing fuses into the surrounding XLA graph.
custom_linear_jit = jax.jit(custom_linear)


if __name__ == "__main__":
    # Module: CustomLinearModule(size=100); input x of shape (8, 100), matching
    # the reference script's `torch.rand((8, 100))`.
    size = 100
    batch = 8

    key = jax.random.PRNGKey(0)
    kx, kw = jax.random.split(key)
    # torch.rand -> uniform [0, 1)
    x = jax.random.uniform(kx, (batch, size), dtype=jnp.float32)
    weight = jax.random.uniform(kw, (size, size), dtype=jnp.float32)

    out = custom_linear_jit(x, weight)
    out = jax.block_until_ready(out)

    # Sanity check against plain-JAX reference of F.linear semantics.
    ref = x @ weight.T
    assert out.shape == (batch, size)
    assert jnp.allclose(out, ref, atol=1e-4, rtol=1e-4)

    print("KERNEL_OK")
</pallas_src>

<mosaic_0001>
module attributes {stable_mosaic.version = 11 : i64} {
  func.func @_linear_kernel(%arg0: memref<8x128xf32, #tpu.memory_space<vmem>>, %arg1: memref<128x128xf32, #tpu.memory_space<vmem>>, %arg2: memref<8x128xf32, #tpu.memory_space<vmem>>) attributes {dimension_semantics = [], scalar_prefetch = 0 : i64, scratch_operands = 0 : i64, tpu.core_type = #tpu.core_type<tc>} {
    %c0 = arith.constant 0 : index
    %c0_0 = arith.constant 0 : index
    %0 = vector.load %arg0[%c0, %c0_0] : memref<8x128xf32, #tpu.memory_space<vmem>>, vector<8x128xf32>
    %c0_1 = arith.constant 0 : index
    %c0_2 = arith.constant 0 : index
    %1 = vector.load %arg1[%c0_1, %c0_2] : memref<128x128xf32, #tpu.memory_space<vmem>>, vector<128x128xf32>
    %cst = arith.constant dense<0.000000e+00> : vector<8x128xf32>
    %2 = tpu.matmul %0, %1, %cst {dimension_numbers = #tpu.dot_dimension_numbers<[1], [0], [0], [1], [0, 0, 1, 1], [], []>} : vector<8x128xf32>, vector<128x128xf32>, vector<8x128xf32> -> vector<8x128xf32>
    %c0_3 = arith.constant 0 : index
    %c0_4 = arith.constant 0 : index
    %3 = vector.load %arg2[%c0_3, %c0_4] : memref<8x128xf32, #tpu.memory_space<vmem>>, vector<8x128xf32>
    tpu.vector_store %arg2[%c0_3, %c0_4], %2 {strides = array<i32>} : memref<8x128xf32, #tpu.memory_space<vmem>>, vector<8x128xf32>,
    return
  }
}

</mosaic_0001>

<bundles_post_ra>
// kernel: custom_linear.1
= control target key start
LH: loop header
LB: loop body
LE: loop exit
PB: predicated region body
PF: predicated region fallthrough
CT: control target
= control target key end

     0   :  { %v218_v3 = vmov 0.0|0.0   ;;  %vm219_vm0 = vmmov 0   ;;  %v220_v6 = vmov 0.0   ;;  %s300_s0 = inlined_call_operand.vmem [shape: f32[8,128], index: 0, kind: input, shape index: {}]   ;;  %s301_s1 = inlined_call_operand.vmem [shape: f32[128,128], index: 1, kind: input, shape index: {}]   ;;  %s302_s2 = inlined_call_operand.hbm [shape: f32[8,128], index: 2, kind: output, shape index: {}]  }
   0x1   :  { %v13_v0 = vld [vmem:[%s301_s1] sm:$0xff]  ;;  %v14_v1 = vld [vmem:[%s301_s1 + $0x8] sm:$0xff]  ;;  %v15_v2 = vld [vmem:[%s301_s1 + $0x10] sm:$0xff]  ;;  %166 = vmatprep.subr.bf16.mxu0 %v218_v3  ;;  %163 = vmatprep.mubr.msk.f32.mxu0 %vm219_vm0, %v220_v6 }
   0x2   :  { %v167_v4 = vpack.c.bf16 %v14_v1, %v13_v0  ;;  %v16_v5 = vld [vmem:[%s301_s1 + $0x18] sm:$0xff]  ;;  %v17_v8 = vld [vmem:[%s301_s1 + $0x20] sm:$0xff]  ;;  %v18_v9 = vld [vmem:[%s301_s1 + $0x28] sm:$0xff] }
   0x3   :  { %v170_v7 = vpack.c.bf16 %v16_v5, %v15_v2 }
   0x4   :  { %168 = vmatpush3.bf16.msra.mxu0 %v167_v4 }
   0x5   :  { %169 = vmatprep.subr.bf16.mxu0 %v218_v3 }
   0x6   :  { %7 = vsyncpa [#allocation3], 0  ;;  %v173_v10 = vpack.c.bf16 %v18_v9, %v17_v8  ;;  %v19_v11 = vld [vmem:[%s301_s1 + $0x30] sm:$0xff]  ;;  %v20_v12 = vld [vmem:[%s301_s1 + $0x38] sm:$0xff]  ;;  %s221_s15 = smov [#allocation2]  }
   0x7   :  { %v176_v13 = vpack.c.bf16 %v20_v12, %v19_v11  ;;  %v21_v14 = vld [vmem:[%s301_s1 + $0x40] sm:$0xff]  ;;  %v22_v15 = vld [vmem:[%s301_s1 + $0x48] sm:$0xff]  ;;  %v23_v17 = vld [vmem:[%s301_s1 + $0x50] sm:$0xff]  ;;  %s106_s16 = sshll.u32 %s221_s15, 4  ;;  %s107_s16 = int_to_ptr.vmem [resolvable:$true] %s106_s16 }
   0x8   :  { %171 = vmatpush3.bf16.msra.mxu0 %v170_v7  ;;  %v179_v16 = vpack.c.bf16 %v22_v15, %v21_v14  ;;  %v24_v18 = vld [vmem:[%s301_s1 + $0x58] sm:$0xff]  ;;  %v25_v20 = vld [vmem:[%s301_s1 + $0x60] sm:$0xff]  ;;  %v26_v21 = vld [vmem:[%s301_s1 + $0x68] sm:$0xff]  ;;  %s194_s17 = scalar_lea.vmem %s107_s16, 128  ;;  %p199_p1 = scmp.lt.s32.totalorder %s107_s16, %s107_s16 }
   0x9   :  { %172 = vmatprep.subr.bf16.mxu0 %v218_v3  ;;  %v182_v19 = vpack.c.bf16 %v24_v18, %v23_v17  ;;  %v185_v22 = vpack.c.bf16 %v26_v21, %v25_v20  ;;  %v27_v23 = vld [vmem:[%s301_s1 + $0x70] sm:$0xff]  ;;  %v28_v24 = vld [vmem:[%s301_s1 + $0x78] sm:$0xff]  ;;  %v12_v26 = vld [vmem:[%s300_s0] sm:$0xff]  ;;  %p195_p0 = scmp.ne.s32.totalorder %s107_s16, %s194_s17  ;;  %p200_p2 = scmp.lt.s32.totalorder %s194_s17, %s194_s17 }
   0xa   :  { %v188_v25 = vpack.c.bf16 %v28_v24, %v27_v23 }
   0xb   :  { %p201_p3 = por %p200_p2, %p199_p1 }
   0xc   :  { %174 = vmatpush3.bf16.msra.mxu0 %v173_v10 }
   0xd   :  { %175 = vmatprep.subr.bf16.mxu0 %v218_v3  ;;  %p202_p4 = pnand %p201_p3, %p195_p0 }
  0x10   :  { %177 = vmatpush3.bf16.msra.mxu0 %v176_v13 }
  0x11   :  { %178 = vmatprep.subr.bf16.mxu0 %v218_v3 }
  0x14   :  { %180 = vmatpush3.bf16.msra.mxu0 %v179_v16 }
  0x15   :  { %181 = vmatprep.subr.bf16.mxu0 %v218_v3 }
  0x18   :  { %183 = vmatpush3.bf16.msra.mxu0 %v182_v19 }
  0x19   :  { %184 = vmatprep.subr.bf16.mxu0 %v218_v3 }
  0x1c   :  { %186 = vmatpush3.bf16.msra.mxu0 %v185_v22 }
  0x1d   :  { %187 = vmatprep.subr.bf16.mxu0 %v218_v3 }
  0x20   :  { %189 = vmatpush3.bf16.msra.mxu0 %v188_v25 }
  0x23   :  { %164 = vmatmul.mubr.f32.vlgmr.msra.gmra.mrb[0].mxu0 %v12_v26 }
  0xf6   :  { %v95_v27 = vpop.f32.mrb[0].mxu0 }
  0xf7   :  { %99 = vst [vmem:[#allocation2] sm:$0xff] %v95_v27  ;;  %v165_v28 = vpop.f32.mrb[1].mxu0 }
  0xf8   :  { %205 = shalt.err (!%p202_p4)
}
  0xf9   :  { %s206_s19 = scalar_lea.hbm %s302_s2, 128 }
  0xfa   :  { %p207_p5 = scmp.ne.s32.totalorder %s302_s2, %s206_s19  ;;  %p210_p6 = scmp.lt.u32.totalorder %s206_s19, %s302_s2 }
  0xfc   :  { %p212_p7 = pnand %p210_p6, %p207_p5 }
  0xfe   :  { %215 = shalt.err (!%p212_p7)
}
  0xff   :  { %109 = dma.vmem_to_hbm [thread:$0]  %s107_s16, 128, %s302_s2, [#allocation3]  }
 0x100   :  { %216 = dma.done.wait [#allocation3], 128  }
 0x101   :  { %217 = vsyncadd [#allocation3], 4294967168 }
 0x102   :  { %113 = vsyncpa [#allocation3], 1 }

</bundles_post_ra>
